<compile_context>
chip_gen: v5e
topology: v5e:2x2
jax: 0.10.0
libtpu: 0.0.40
codegen_flags: <defaults>
</compile_context>

<pallas_src>
import jax
import jax.numpy as jnp
from jax.experimental import pallas as pl
from jax.experimental.pallas import tpu as pltpu


def _se_kernel(x_ref, w1t_ref, b1_ref, w2t_ref, b2_ref, o_ref):
    # x_ref: (Bn, C, HW); w1t: (C, H1); b1: (1, H1); w2t: (H1, C); b2: (1, C)
    x = x_ref[...]                                        # native dtype

    # Squeeze: global average pool over HW (lane-axis reduction), f32 accum.
    mean = jnp.mean(x.astype(jnp.float32), axis=-1)       # (Bn, C)

    # Excite: two 1x1 convs as small batched matmuls (+bias), ReLU / Sigmoid.
    h = jnp.dot(mean, w1t_ref[...],
                preferred_element_type=jnp.float32) + b1_ref[...]   # (Bn, H1)
    h = jnp.maximum(h, 0.0)
    s = jnp.dot(h, w2t_ref[...],
                preferred_element_type=jnp.float32) + b2_ref[...]   # (Bn, C)
    s = jax.nn.sigmoid(s)

    # Scale: broadcast per-channel gate over HW lanes; multiply in x's dtype.
    o_ref[...] = (x * s.astype(x.dtype)[:, :, None]).astype(o_ref.dtype)


def _pick_batch_block(n, c, hw, itemsize):
    """Largest divisor of n whose block fits the VMEM budget while keeping
    >= 2 grid steps when n >= 2 (v7x has 2 TensorCores to shard over)."""
    budget = 16 * 1024 * 1024                 # in + out, double-buffered
    max_bn = max(1, budget // (4 * c * hw * itemsize))
    best = 1
    for cand in range(1, n + 1):
        if n % cand or cand > max_bn:
            continue
        if n == 1 or n // cand >= 2:
            best = cand
    return best


@jax.jit
def channel_se_layer(x, w1, b1, w2, b2):
    """x: (N, C, H, W); w1: (H1, C); b1: (H1,); w2: (C, H1); b2: (C,)."""
    N, C, H, W = x.shape
    HW = H * W
    H1 = w1.shape[0]
    itemsize = jnp.dtype(x.dtype).itemsize

    bn = _pick_batch_block(N, C, HW, itemsize)
    grid_n = N // bn
    block_bytes = bn * C * HW * itemsize
    # Scoped VMEM sized to the double-buffered blocks (+ weights + headroom),
    # capped so it stays safe on v7x (64 MiB physical per TensorCore).
    vmem_limit = int(min(max(6 * block_bytes + (4 << 20), 16 << 20), 48 << 20))

    x_flat = x.reshape(N, C, HW)
    w1t = w1.T                     # (C, H1)
    w2t = w2.T                     # (H1, C)
    b1_row = b1.reshape(1, H1)     # lane-dense bias rows
    b2_row = b2.reshape(1, C)

    # TODO(synk): for very large C*HW (block over the VMEM budget even at
    # bn=1) this should switch to an HW-tiled two-pass structure
    # (pooling pass with an 'arbitrary' reduction axis + scale pass).

    out_flat = pl.pallas_call(
        _se_kernel,
        out_shape=jax.ShapeDtypeStruct((N, C, HW), x.dtype),
        grid_spec=pltpu.PrefetchScalarGridSpec(
            num_scalar_prefetch=0,
            grid=(grid_n,),
            in_specs=[
                pl.BlockSpec((bn, C, HW), lambda n: (n, 0, 0)),
                pl.BlockSpec((C, H1), lambda n: (0, 0)),
                pl.BlockSpec((1, H1), lambda n: (0, 0)),
                pl.BlockSpec((H1, C), lambda n: (0, 0)),
                pl.BlockSpec((1, C), lambda n: (0, 0)),
            ],
            out_specs=pl.BlockSpec((bn, C, HW), lambda n: (n, 0, 0)),
        ),
        compiler_params=pltpu.CompilerParams(
            dimension_semantics=("parallel",),
            vmem_limit_bytes=vmem_limit),
    )(x_flat, w1t, b1_row, w2t, b2_row)

    return out_flat.reshape(N, C, H, W)


def _reference(x, w1, b1, w2, b2):
    # Plain-JAX reference of the PyTorch forward (NCHW).
    mean = jnp.mean(x, axis=(2, 3))                       # (N, C)
    h = jnp.maximum(mean @ w1.T + b1, 0.0)                # (N, H1)
    s = jax.nn.sigmoid(h @ w2.T + b2)                     # (N, C)
    return x * s[:, :, None, None]


if __name__ == "__main__":
    # Module config implied by forward: in_size=C, reduction=4, min_hidden=8
    N, C, H, W = 2, 4, 16, 16
    hidden = max(C // 4, 8)  # = 8

    key = jax.random.PRNGKey(0)
    kx, k1, k2, k3, k4 = jax.random.split(key, 5)

    x = jax.random.normal(kx, (N, C, H, W), dtype=jnp.float32)
    # Conv2d 1x1 weights: (out_ch, in_ch, 1, 1) -> stored as (out_ch, in_ch)
    w1 = 0.1 * jax.random.normal(k1, (hidden, C), dtype=jnp.float32)
    b1 = 0.1 * jax.random.normal(k2, (hidden,), dtype=jnp.float32)
    w2 = 0.1 * jax.random.normal(k3, (C, hidden), dtype=jnp.float32)
    b2 = 0.1 * jax.random.normal(k4, (C,), dtype=jnp.float32)

    out = channel_se_layer(x, w1, b1, w2, b2)
    out = jax.block_until_ready(out)

    ref = _reference(x, w1, b1, w2, b2)
    assert out.shape == (N, C, H, W)
    assert jnp.allclose(out, ref, atol=1e-5, rtol=1e-5), "mismatch vs reference"

    print("KERNEL_OK")
</pallas_src>

<mosaic_0001>
module attributes {stable_mosaic.version = 11 : i64} {
  func.func @_se_kernel(%arg0: i32, %arg1: memref<1x4x256xf32, #tpu.memory_space<vmem>>, %arg2: memref<4x8xf32, #tpu.memory_space<vmem>>, %arg3: memref<1x8xf32, #tpu.memory_space<vmem>>, %arg4: memref<8x4xf32, #tpu.memory_space<vmem>>, %arg5: memref<1x4xf32, #tpu.memory_space<vmem>>, %arg6: memref<1x4x256xf32, #tpu.memory_space<vmem>>) attributes {dimension_semantics = [#tpu.dimension_semantics<parallel>], iteration_bounds = array<i64: 2>, scalar_prefetch = 0 : i64, scratch_operands = 0 : i64, tpu.core_type = #tpu.core_type<tc>, window_params = [{transform_indices = @transform_0, window_bounds = array<i64: 1, 4, 256>}, {pipeline_mode = #tpu.pipeline_mode<synchronous>, transform_indices = @transform_1, window_bounds = array<i64: 4, 8>}, {pipeline_mode = #tpu.pipeline_mode<synchronous>, transform_indices = @transform_2, window_bounds = array<i64: 1, 8>}, {pipeline_mode = #tpu.pipeline_mode<synchronous>, transform_indices = @transform_3, window_bounds = array<i64: 8, 4>}, {pipeline_mode = #tpu.pipeline_mode<synchronous>, transform_indices = @transform_4, window_bounds = array<i64: 1, 4>}, {transform_indices = @transform_5, window_bounds = array<i64: 1, 4, 256>}]} {
    %c0 = arith.constant 0 : index
    %c0_0 = arith.constant 0 : index
    %c0_1 = arith.constant 0 : index
    %0 = vector.load %arg1[%c0, %c0_0, %c0_1] : memref<1x4x256xf32, #tpu.memory_space<vmem>>, vector<1x4x256xf32>
    %cst = arith.constant dense<0.000000e+00> : vector<1x4xf32>
    %1 = vector.multi_reduction <add>, %0, %cst [2] : vector<1x4x256xf32> to vector<1x4xf32>
    %cst_2 = arith.constant 2.560000e+02 : f32
    %2 = vector.broadcast %cst_2 : f32 to vector<1x4xf32>
    %3 = arith.divf %1, %2 : vector<1x4xf32>
    %c0_3 = arith.constant 0 : index
    %c0_4 = arith.constant 0 : index
    %4 = vector.load %arg2[%c0_3, %c0_4] : memref<4x8xf32, #tpu.memory_space<vmem>>, vector<4x8xf32>
    %cst_5 = arith.constant dense<0.000000e+00> : vector<1x8xf32>
    %5 = tpu.matmul %3, %4, %cst_5 {dimension_numbers = #tpu.dot_dimension_numbers<[1], [0], [0], [1], [0, 0, 1, 1], [], []>} : vector<1x4xf32>, vector<4x8xf32>, vector<1x8xf32> -> vector<1x8xf32>
    %c0_6 = arith.constant 0 : index
    %c0_7 = arith.constant 0 : index
    %6 = vector.load %arg3[%c0_6, %c0_7] : memref<1x8xf32, #tpu.memory_space<vmem>>, vector<1x8xf32>
    %7 = arith.addf %5, %6 : vector<1x8xf32>
    %cst_8 = arith.constant 0.000000e+00 : f32
    %8 = vector.broadcast %cst_8 : f32 to vector<1x8xf32>
    %9 = arith.maximumf %7, %8 : vector<1x8xf32>
    %c0_9 = arith.constant 0 : index
    %c0_10 = arith.constant 0 : index
    %10 = vector.load %arg4[%c0_9, %c0_10] : memref<8x4xf32, #tpu.memory_space<vmem>>, vector<8x4xf32>
    %cst_11 = arith.constant dense<0.000000e+00> : vector<1x4xf32>
    %11 = tpu.matmul %9, %10, %cst_11 {dimension_numbers = #tpu.dot_dimension_numbers<[1], [0], [0], [1], [0, 0, 1, 1], [], []>} : vector<1x8xf32>, vector<8x4xf32>, vector<1x4xf32> -> vector<1x4xf32>
    %c0_12 = arith.constant 0 : index
    %c0_13 = arith.constant 0 : index
    %12 = vector.load %arg5[%c0_12, %c0_13] : memref<1x4xf32, #tpu.memory_space<vmem>>, vector<1x4xf32>
    %13 = arith.addf %11, %12 : vector<1x4xf32>
    %14 = arith.negf %13 : vector<1x4xf32>
    %15 = math.exp %14 : vector<1x4xf32>
    %cst_14 = arith.constant 1.000000e+00 : f32
    %16 = vector.broadcast %cst_14 : f32 to vector<1x4xf32>
    %17 = arith.addf %16, %15 : vector<1x4xf32>
    %18 = arith.divf %16, %17 : vector<1x4xf32>
    %19 = vector.shape_cast %18 : vector<1x4xf32> to vector<1x4x1xf32>
    %20 = vector.broadcast %19 : vector<1x4x1xf32> to vector<1x4x256xf32>
    %21 = arith.mulf %0, %20 : vector<1x4x256xf32>
    %c0_15 = arith.constant 0 : index
    %c0_16 = arith.constant 0 : index
    %c0_17 = arith.constant 0 : index
    %22 = vector.load %arg6[%c0_15, %c0_16, %c0_17] : memref<1x4x256xf32, #tpu.memory_space<vmem>>, vector<1x4x256xf32>
    tpu.vector_store %arg6[%c0_15, %c0_16, %c0_17], %21 {strides = array<i32>} : memref<1x4x256xf32, #tpu.memory_space<vmem>>, vector<1x4x256xf32>,
    return
  }
  func.func @transform_0(%arg0: i32) -> (i32, i32, i32) {
    %c0_i32 = arith.constant 0 : i32
    %c0_i32_0 = arith.constant 0 : i32
    %c0_i32_1 = arith.constant 0 : i32
    return %arg0, %c0_i32, %c0_i32_0 : i32, i32, i32
  }
  func.func @transform_1(%arg0: i32) -> (i32, i32) {
    %c0_i32 = arith.constant 0 : i32
    %c0_i32_0 = arith.constant 0 : i32
    %c0_i32_1 = arith.constant 0 : i32
    return %c0_i32, %c0_i32_0 : i32, i32
  }
  func.func @transform_2(%arg0: i32) -> (i32, i32) {
    %c0_i32 = arith.constant 0 : i32
    %c0_i32_0 = arith.constant 0 : i32
    %c0_i32_1 = arith.constant 0 : i32
    return %c0_i32, %c0_i32_0 : i32, i32
  }
  func.func @transform_3(%arg0: i32) -> (i32, i32) {
    %c0_i32 = arith.constant 0 : i32
    %c0_i32_0 = arith.constant 0 : i32
    %c0_i32_1 = arith.constant 0 : i32
    return %c0_i32, %c0_i32_0 : i32, i32
  }
  func.func @transform_4(%arg0: i32) -> (i32, i32) {
    %c0_i32 = arith.constant 0 : i32
    %c0_i32_0 = arith.constant 0 : i32
    %c0_i32_1 = arith.constant 0 : i32
    return %c0_i32, %c0_i32_0 : i32, i32
  }
  func.func @transform_5(%arg0: i32) -> (i32, i32, i32) {
    %c0_i32 = arith.constant 0 : i32
    %c0_i32_0 = arith.constant 0 : i32
    %c0_i32_1 = arith.constant 0 : i32
    return %arg0, %c0_i32, %c0_i32_0 : i32, i32, i32
  }
}

</mosaic_0001>

<bundles_post_ra>
// kernel: channel_se_layer.1
= control target key start
LH: loop header
LB: loop body
LE: loop exit
PB: predicated region body
PF: predicated region fallthrough
CT: control target
= control target key end

     0   :  { %s468_s18 = smov 0   ;;  %s508_s0 = inlined_call_operand.vmem [shape: f32[2,4,256], index: 0, kind: input, shape index: {}]   ;;  %s509_s1 = inlined_call_operand.vmem [shape: f32[4,8], index: 1, kind: input, shape index: {}]   ;;  %s510_s2 = inlined_call_operand.vmem [shape: f32[1,8], index: 2, kind: input, shape index: {}]   ;;  %s511_s3 = inlined_call_operand.vmem [shape: f32[8,4], index: 3, kind: input, shape index: {}]   ;;  %s512_s4 = inlined_call_operand.vmem [shape: f32[1,4], index: 4, kind: input, shape index: {}]   ;;  %s513_s5 = inlined_call_operand.vmem [shape: f32[2,4,256], index: 5, kind: output, shape index: {}]  }
   0x1 LB: > { %s394_s19 = sadd.s32 4294967295, %s434_s18   ;;  %p398_p0 = scmp.ge.s32.totalorder %s434_s18, 1  ;;  %s434_s18 = sphi %s468_s18, %s15_s18  }
   0x2   : > { %p187_p1 = scmp.lt.s32.totalorder %s434_s18, 3 }
   0x4   : > { %p188_p2 = pnand %p398_p0, %p187_p1 }
   0x5   : > { %p215_p3 = scmp.lt.s32.totalorder (!%p188_p2), %s394_s19, 1 }
   0x6   : > { %191 = sbr.rel (%p188_p2) target bundleno = 554 (0x22a), region = 40 }
   0xb   : > { %s515_s19 = smov (!%p215_p3, %s394_s19), 1  ;;  %vm232_vm0 = vcmask 1043456   ;;  %v246_v6 = vld [vmem:[%s509_s1] sm:$0xf]  ;;  %v436_v7 = vmov 256.0   ;;  %v249_v13 = vlaneseq  ;;  %vm252_vm2 = vcmask 31744  }
   0xc   : > { %s409_s20 = sshll.u32 %s515_s19, 3  ;;  %403 = vmatpush.msk.msra.mxu0 %vm232_vm0, %v246_v6  ;;  %422 = vrcp.f32 %v436_v7  ;;  %v279_v19 = vld [vmem:[%s511_s3] sm:$0xff]  ;;  %vm281_vm3 = vcmask 64512   ;;  %v437_v42 = vmov 839922192  }
   0xd   : > { %s219_s23 = scalar_lea.vmem %s508_s0, %s409_s20  ;;  %v250_v15 = vand.u32 127, %v249_v13  ;;  %300 = vmatpush.msra.mxu1 %v279_v19  ;;  %v247_v20 = vld [vmem:[%s510_s2] sm:$0x1]  ;;  %v326_v24 = vshrl.u32 %v249_v13, 7  ;;  %v333_v43 = vunpack.c.l.s4 %v437_v42  ;;  %s224_s9 = scalar_lea.vmem %s513_s5, %s409_s20 }
   0xe   : > { %v484_v0 = vld [vmem:[%s219_s23] sm:$0xff] }
   0xf   : > { %227 = vst [vmem:[#allocation1] ss:$2 sm:$0xff] %v484_v0  ;;  %421 = vset.pattern.permute.xlu0 %v326_v24  ;;  %v280_v25 = vld [vmem:[%s512_s4] sm:$0x1]  ;;  %v334_v44 = vunpack.c.0.s8 %v333_v43 }
  0x12   : > { %v423_v8 = vpop.eup %422 }
  0x13   : > { %v239_v9 = vmul.f32 256.0, %v423_v8  ;;  %vm243_vm1 = vweird.f32 %v423_v8 }
  0x15   : > { %v240_v10 = vsub.f32 1.0, %v239_v9 }
  0x16   : > { %v228_v1 = vld.sshfl [vmem:[#allocation1] sm:$0xff pattern:$0x75316420]  ;;  %v229_v2 = vld.sshfl [vmem:[#allocation1 + $0x8] sm:$0xff pattern:$0x75316420] }
  0x17   : > { %v233_v3 = vsel %vm232_vm0, %v228_v1, 0.0  ;;  %v234_v4 = vsel %vm232_vm0, %v229_v2, 0.0  ;;  %v241_v11 = vmul.f32 %v423_v8, %v240_v10 }
  0x18   : > { %v235_v5 = vadd.f32 %v234_v4, %v233_v3 }
  0x19   : > { %v242_v12 = vadd.f32 %v423_v8, %v241_v11 }
  0x1a   : > { %236 = vadd.xlane.f32.xlu0 %v235_v5 }
  0x1b   : > { %v244_v14 = vsel %vm243_vm1, %v423_v8, %v242_v12 }
  0x8d   : > { %v237_v16 = vpop.xlane.xlu0 %236 }
  0x8e   : > { %v245_v17 = vmul.f32 %v244_v14, %v237_v16 }
  0x90   : > { %v251_v18 = vperm.slane %v245_v17, %v250_v15 }
  0x92   : > { %404 = vmatmul.msk.f32.vlgmr.msra.gmra.mxu0 %vm252_vm2, %v251_v18 }
 0x10f   : > { %v275_v21 = vpop.f32.mrf.mxu0 }
 0x110   : > { %v276_v22 = vadd.f32 %v275_v21, %v247_v20 }
 0x112   : > { %v278_v23 = vmax.f32 %v276_v22, 0.0 }
 0x114   : > { %405 = vmatmul.msk.f32.vlgmr.msra.gmra.mxu1 %vm281_vm3, %v278_v23 }
 0x191   : > { %v302_v26 = vpop.f32.mrf.mxu1 }
 0x192   : > { %v303_v27 = vadd.f32 %v302_v26, %v280_v25 }
 0x194   : > { %v406_v28 = vmul.f32 -1.442695, %v303_v27 }
 0x196   : > { %424 = vpow2.f32 %v406_v28 }
 0x19c   : > { %v425_v29 = vpop.eup %424 }
 0x19d   : > { %v308_v30 = vadd.f32 1.0, %v425_v29 }
 0x19f   : > { %426 = vrcp.f32 %v308_v30  ;;  %v320_v34 = vand.u32 2147483648, %v308_v30  ;;  %v318_v36 = vand.u32 2147483647, %v308_v30  ;;  %vm314_vm5 = vweird.f32 %v308_v30 }
 0x1a1   : > { %v321_v38 = vor.u32 1.1754944e-38, %v320_v34  ;;  %vm319_vm7 = vcmp.eq.f32.partialorder %v318_v36, 8.507059e+37 }
 0x1a5   : > { %v427_v31 = vpop.eup %426 }
 0x1a6   : > { %v310_v32 = vmul.f32 %v427_v31, %v308_v30  ;;  %vm315_vm4 = vweird.f32 %v427_v31 }
 0x1a7   : > { %vm316_vm6 = vmor %vm314_vm5, %vm315_vm4 }
 0x1a8   : > { %v311_v33 = vsub.f32 1.0, %v310_v32 }
 0x1aa   : > { %v312_v35 = vmul.f32 %v427_v31, %v311_v33 }
 0x1ac   : > { %v313_v37 = vadd.f32 %v427_v31, %v312_v35 }
 0x1ae   : > { %v317_v39 = vsel %vm316_vm6, %v427_v31, %v313_v37 }
 0x1af   : > { %v322_v40 = vsel %vm319_vm7, %v321_v38, %v317_v39 }
 0x1b0   : > { %v324_v41 = vperm.slane %v322_v40, 0 }
 0x1b2   : > { %329 = vperm.xlu0 %421, %v324_v41  }
 0x224   : > { %v330_v45 = vpop.permute.xlu0 %329 }
 0x225   : > { %v335_v46 = vperm.slane %v330_v45, %v334_v44 }
 0x227   : > { %v337_v47 = vmul.f32 %v335_v46, %v484_v0 }
 0x229   : > { %338 = vst [vmem:[%s224_s9] sm:$0xff] %v337_v47 }
 0x22a PF: > { %s15_s18 = sadd.s32 1, %s434_s18  }
 0x22b   : > { %p12_p4 = scmp.ge.s32.totalorder %s15_s18, 4  }
 0x22d   :  { %14 = sbr.rel (!%p12_p4) target bundleno = 1 (0x1), region = 70 }

</bundles_post_ra>
